<compile_context>
chip_gen: v6e
topology: v6e:2x2x1
jax: 0.10.0
libtpu: 0.0.40
codegen_flags: <defaults>
</compile_context>

<pallas_src>
import functools

import jax
import jax.numpy as jnp
from jax.experimental import pallas as pl
from jax.experimental.pallas import tpu as pltpu


def _dt_minexp_kernel(x_ref, ct2_ref, c2_ref, nscale_ref, o_ref, *,
                      num_centers, eps, exp_in_bf16):
    # x_ref:      (TB, D)   streamed tile of inputs (native dtype)
    # ct2_ref:    (D, Cp)   -2 * centers^T (resident)
    # c2_ref:     (1, Cp)   precomputed ||c||^2 (f32, resident)
    # nscale_ref: (1, Cp)   precomputed -scaler (f32, resident)
    # o_ref:      (TB, Cp)  output tile
    x = x_ref[...]
    ct2 = ct2_ref[...]
    x_mxu = x if x.dtype == ct2.dtype else x.astype(ct2.dtype)

    # -2 * (x . c) on the MXU, accumulated in f32.
    xc = jnp.dot(x_mxu, ct2, preferred_element_type=jnp.float32)        # (TB, Cp)

    xf = x.astype(jnp.float32)
    x2 = jnp.sum(xf * xf, axis=-1, keepdims=True)                       # (TB, 1)

    # squared Euclidean distance (clamped), sqrt == cdist p=2.
    sq = jnp.maximum(xc + x2 + c2_ref[...], 0.0)                        # (TB, Cp)
    d_raw = jnp.sqrt(sq)

    c_pad = sq.shape[-1]
    if c_pad != num_centers:
        # lane-padded centers: exclude padded lanes from min / variance sums.
        lane = jax.lax.broadcasted_iota(jnp.int32, sq.shape, 1)
        valid = lane < num_centers
        d_for_min = jnp.where(valid, d_raw, jnp.inf)
        s1 = jnp.sum(jnp.where(valid, d_raw, 0.0), axis=-1, keepdims=True)
        s2 = jnp.sum(jnp.where(valid, sq, 0.0), axis=-1, keepdims=True)
    else:
        d_for_min = d_raw
        s1 = jnp.sum(d_raw, axis=-1, keepdims=True)
        s2 = jnp.sum(sq, axis=-1, keepdims=True)

    d_min = jnp.min(d_for_min, axis=-1, keepdims=True)

    # unbiased variance; shift-invariant, so computing it on the raw distances
    # (before the min subtraction) is mathematically identical:
    #   var = (sum(d^2) - sum(d)^2 / C) / (C - 1)
    inv_c = 1.0 / float(num_centers)
    var = (s2 - s1 * s1 * inv_c) * (1.0 / float(num_centers - 1))
    var = jnp.maximum(var, 0.0)
    inv_std = jax.lax.rsqrt(var + eps)                                  # (TB, 1)

    # exp(-(d - min)/std * scaler) == exp((d_raw - min) * inv_std * (-scaler))
    arg = (d_raw - d_min) * (inv_std * nscale_ref[...])
    if exp_in_bf16:
        arg = arg.astype(jnp.bfloat16)
    o_ref[...] = jnp.exp(arg).astype(o_ref.dtype)


def _round_up(n, m):
    return ((n + m - 1) // m) * m


def _vmem_capacity_bytes():
    try:
        return int(pltpu.get_tpu_info().vmem_capacity_bytes)
    except Exception:
        return 64 * 2**20   # v7x per-TensorCore floor; v5e/v6e have 128 MiB.


def distance_transform_minexp(x, centers, scaler, *, eps=1e-5, block_b=None,
                              out_dtype=None, exp_in_bf16=False,
                              dot_in_bf16=False, single_buffer_resident=False):
    """x: (B, D), centers: (C, D), scaler: (1, C) -> (B, C).

    out_dtype=jnp.bfloat16 halves the dominant (B, C) writeback stream
    (recommended on v5e/v6e); exp_in_bf16=True additionally runs the EUP exp in
    bf16 (v6e/v7x only).  dot_in_bf16=True feeds bf16 operands to the MXU.
    """
    B, D = x.shape
    C, Dc = centers.shape
    assert D == Dc
    assert C >= 2, "unbiased variance (N-1 denominator) needs num_centers >= 2"
    if out_dtype is None:
        out_dtype = x.dtype
    out_dtype = jnp.dtype(out_dtype)

    # ---- lane padding: keep the output last dim a multiple of 128 so stores
    # are lane-dense; padded lanes are masked out of min / variance in-kernel.
    C_pad = max(128, _round_up(C, 128))
    if C_pad != C:
        centers_p = jnp.pad(centers, ((0, C_pad - C), (0, 0)))
        scaler_p = jnp.pad(scaler, ((0, 0), (0, C_pad - C)))
    else:
        centers_p, scaler_p = centers, scaler

    # ---- batch tiling (no input padding / output slicing on the batch axis).
    # Big tiles amortize the ~0.35us per-grid-step overhead; keep >= 2 grid
    # steps when B >= 16 so both v7x TensorCores get work.
    if block_b is None:
        block_b = 2048
    block_b = max(8, _round_up(block_b, 8))
    block_b = min(block_b, _round_up(B, 8))
    if B >= 16 and block_b >= B:
        block_b = min(block_b, _round_up(pl.cdiv(B, 2), 8))
    grid = (pl.cdiv(B, block_b),)

    # ---- constant-per-call tensors hoisted out of the kernel (plain JAX glue):
    ct_dtype = jnp.bfloat16 if dot_in_bf16 else centers_p.dtype
    centers_t2 = (centers_p.T * (-2.0)).astype(ct_dtype)                 # (D, Cp)
    c2 = jnp.sum(centers_p.astype(jnp.float32) ** 2, axis=-1)[None, :]   # (1, Cp)
    neg_scaler = -scaler_p.astype(jnp.float32)                           # (1, Cp)

    # TODO(synk): optional bias=True branch (out + bias) not implemented; the
    # module default is bias=False.

    kernel = functools.partial(_dt_minexp_kernel, num_centers=C,
                               eps=float(eps), exp_in_bf16=bool(exp_in_bf16))

    # ---- VMEM budget: streamed blocks double-buffered; cap at the actual
    # chip's VMEM capacity (v7x: 64 MiB/TC) with headroom for compiler scratch.
    itm_x = jnp.dtype(x.dtype).itemsize
    itm_c = jnp.dtype(ct_dtype).itemsize
    itm_o = out_dtype.itemsize
    res_buf = 1 if single_buffer_resident else 2
    footprint = (res_buf * (D * C_pad * itm_c + 2 * C_pad * 4)   # residents
                 + 2 * block_b * D * itm_x                       # x tiles
                 + 2 * block_b * C_pad * itm_o)                  # out tiles
    vmem_limit = int(min(int(0.75 * _vmem_capacity_bytes()),
                         max(16 * 2**20, 2 * footprint)))

    resident_kwargs = (
        {"pipeline_mode": pl.Buffered(1)} if single_buffer_resident else {})

    out = pl.pallas_call(
        kernel,
        out_shape=jax.ShapeDtypeStruct((B, C_pad), out_dtype),
        grid_spec=pltpu.PrefetchScalarGridSpec(
            num_scalar_prefetch=0,
            grid=grid,
            in_specs=[
                pl.BlockSpec((block_b, D), lambda i: (i, 0)),     # x (streamed)
                pl.BlockSpec((D, C_pad), lambda i: (0, 0),
                             **resident_kwargs),                  # -2*centers^T
                pl.BlockSpec((1, C_pad), lambda i: (0, 0),
                             **resident_kwargs),                  # ||c||^2
                pl.BlockSpec((1, C_pad), lambda i: (0, 0),
                             **resident_kwargs),                  # -scaler
            ],
            out_specs=pl.BlockSpec((block_b, C_pad), lambda i: (i, 0)),
        ),
        compiler_params=pltpu.CompilerParams(
            dimension_semantics=("parallel",),
            vmem_limit_bytes=vmem_limit,
        ),
    )(x, centers_t2, c2, neg_scaler)

    return out[:, :C] if C_pad != C else out


def _reference(x, centers, scaler, eps=1e-5):
    # pure-JAX reference mirroring the PyTorch forward
    diff = x[:, None, :] - centers[None, :, :]
    d = jnp.sqrt(jnp.sum(diff * diff, axis=-1))
    d = d - jnp.min(d, axis=1, keepdims=True)
    var = jnp.var(d, axis=1, keepdims=True, ddof=1)
    d = d / jnp.sqrt(var + eps)
    return jnp.exp(-d * scaler)


if __name__ == "__main__":
    # Module hyper-parameters (small, consistent with a 2-D (B, input_dim) input)
    input_dim = 32
    num_centers = 128
    eps = 1e-5

    key = jax.random.PRNGKey(0)
    kx1, kx2, kx3, kc, kc3 = jax.random.split(key, 5)

    # deterministic parameter init (matches shapes in __init__)
    centers = jax.random.normal(kc, (num_centers, input_dim), dtype=jnp.float32) / 3.0
    scaler = jnp.ones((1, num_centers), dtype=jnp.float32) * (6.0 / 3.0)
    # bias=False (default) -> no bias parameter

    # Tolerances: the single-pass (shift-invariant) variance trades a little
    # f32 conditioning for one fewer (TB,C) pass; ~1e-3 relative is expected.
    ATOL, RTOL = 2e-3, 3e-3

    # Case 1: single full-tile batch (default block_b).
    x1 = jax.random.normal(kx1, (8, input_dim), dtype=jnp.float32)
    out1 = jax.block_until_ready(distance_transform_minexp(x1, centers, scaler, eps=eps))
    ref1 = _reference(x1, centers, scaler, eps=eps)
    assert out1.shape == (8, num_centers)
    assert jnp.allclose(out1, ref1, atol=ATOL, rtol=RTOL), "case-1 mismatch vs reference"

    # Case 2: 2-step grid with a masked partial tail block (B=20 -> block_b=16).
    x2 = jax.random.normal(kx2, (20, input_dim), dtype=jnp.float32)
    out2 = jax.block_until_ready(distance_transform_minexp(x2, centers, scaler, eps=eps))
    ref2 = _reference(x2, centers, scaler, eps=eps)
    assert out2.shape == (20, num_centers)
    assert jnp.allclose(out2, ref2, atol=ATOL, rtol=RTOL), "case-2 mismatch vs reference"

    # Case 3: C not a multiple of 128 -> lane padding + masked reductions.
    c3 = 96
    centers3 = jax.random.normal(kc3, (c3, input_dim), dtype=jnp.float32) / 3.0
    scaler3 = jnp.ones((1, c3), dtype=jnp.float32) * 2.0
    x3 = jax.random.normal(kx3, (24, input_dim), dtype=jnp.float32)
    out3 = jax.block_until_ready(distance_transform_minexp(x3, centers3, scaler3, eps=eps))
    ref3 = _reference(x3, centers3, scaler3, eps=eps)
    assert out3.shape == (24, c3)
    assert jnp.allclose(out3, ref3, atol=ATOL, rtol=RTOL), "case-3 mismatch vs reference"

    # Case 4: bf16 writeback (epilogue math stays f32; halves output bandwidth).
    out4 = jax.block_until_ready(
        distance_transform_minexp(x1, centers, scaler, eps=eps, out_dtype=jnp.bfloat16))
    assert out4.dtype == jnp.bfloat16
    assert jnp.allclose(out4.astype(jnp.float32), ref1, atol=1e-2, rtol=2e-2), \
        "case-4 mismatch vs reference"

    print("KERNEL_OK")
</pallas_src>

<mosaic_0001>
module attributes {stable_mosaic.version = 11 : i64} {
  func.func @_dt_minexp_kernel(%arg0: i32, %arg1: memref<8x32xf32, #tpu.memory_space<vmem>>, %arg2: memref<32x128xf32, #tpu.memory_space<vmem>>, %arg3: memref<1x128xf32, #tpu.memory_space<vmem>>, %arg4: memref<1x128xf32, #tpu.memory_space<vmem>>, %arg5: memref<8x128xf32, #tpu.memory_space<vmem>>) attributes {dimension_semantics = [#tpu.dimension_semantics<parallel>], iteration_bounds = array<i64: 1>, scalar_prefetch = 0 : i64, scratch_operands = 0 : i64, tpu.core_type = #tpu.core_type<tc>, window_params = [{transform_indices = @transform_0, window_bounds = array<i64: 8, 32>}, {pipeline_mode = #tpu.pipeline_mode<synchronous>, transform_indices = @transform_1, window_bounds = array<i64: 32, 128>}, {pipeline_mode = #tpu.pipeline_mode<synchronous>, transform_indices = @transform_2, window_bounds = array<i64: 1, 128>}, {pipeline_mode = #tpu.pipeline_mode<synchronous>, transform_indices = @transform_3, window_bounds = array<i64: 1, 128>}, {transform_indices = @transform_4, window_bounds = array<i64: 8, 128>}]} {
    %c0 = arith.constant 0 : index
    %c0_0 = arith.constant 0 : index
    %0 = vector.load %arg1[%c0, %c0_0] : memref<8x32xf32, #tpu.memory_space<vmem>>, vector<8x32xf32>
    %c0_1 = arith.constant 0 : index
    %c0_2 = arith.constant 0 : index
    %1 = vector.load %arg2[%c0_1, %c0_2] : memref<32x128xf32, #tpu.memory_space<vmem>>, vector<32x128xf32>
    %cst = arith.constant dense<0.000000e+00> : vector<8x128xf32>
    %2 = tpu.matmul %0, %1, %cst {dimension_numbers = #tpu.dot_dimension_numbers<[1], [0], [0], [1], [0, 0, 1, 1], [], []>} : vector<8x32xf32>, vector<32x128xf32>, vector<8x128xf32> -> vector<8x128xf32>
    %3 = arith.mulf %0, %0 : vector<8x32xf32>
    %cst_3 = arith.constant dense<0.000000e+00> : vector<8xf32>
    %4 = vector.multi_reduction <add>, %3, %cst_3 [1] : vector<8x32xf32> to vector<8xf32>
    %5 = vector.shape_cast %4 : vector<8xf32> to vector<8x1xf32>
    %6 = vector.broadcast %5 : vector<8x1xf32> to vector<8x128xf32>
    %7 = arith.addf %2, %6 : vector<8x128xf32>
    %c0_4 = arith.constant 0 : index
    %c0_5 = arith.constant 0 : index
    %8 = vector.load %arg3[%c0_4, %c0_5] : memref<1x128xf32, #tpu.memory_space<vmem>>, vector<1x128xf32>
    %9 = vector.broadcast %8 : vector<1x128xf32> to vector<8x128xf32>
    %10 = arith.addf %7, %9 : vector<8x128xf32>
    %cst_6 = arith.constant 0.000000e+00 : f32
    %11 = vector.broadcast %cst_6 : f32 to vector<8x128xf32>
    %12 = arith.maximumf %10, %11 : vector<8x128xf32>
    %13 = math.sqrt %12 : vector<8x128xf32>
    %cst_7 = arith.constant dense<0.000000e+00> : vector<8xf32>
    %14 = vector.multi_reduction <add>, %13, %cst_7 [1] : vector<8x128xf32> to vector<8xf32>
    %15 = vector.shape_cast %14 : vector<8xf32> to vector<8x1xf32>
    %cst_8 = arith.constant dense<0.000000e+00> : vector<8xf32>
    %16 = vector.multi_reduction <add>, %12, %cst_8 [1] : vector<8x128xf32> to vector<8xf32>
    %17 = vector.shape_cast %16 : vector<8xf32> to vector<8x1xf32>
    %cst_9 = arith.constant dense<0x7F800000> : vector<8xf32>
    %18 = vector.multi_reduction <minimumf>, %13, %cst_9 [1] : vector<8x128xf32> to vector<8xf32>
    %19 = vector.shape_cast %18 : vector<8xf32> to vector<8x1xf32>
    %20 = arith.mulf %15, %15 : vector<8x1xf32>
    %cst_10 = arith.constant 7.812500e-03 : f32
    %21 = vector.broadcast %cst_10 : f32 to vector<8x1xf32>
    %22 = arith.mulf %20, %21 : vector<8x1xf32>
    %23 = arith.subf %17, %22 : vector<8x1xf32>
    %cst_11 = arith.constant 0.00787401571 : f32
    %24 = vector.broadcast %cst_11 : f32 to vector<8x1xf32>
    %25 = arith.mulf %23, %24 : vector<8x1xf32>
    %cst_12 = arith.constant 0.000000e+00 : f32
    %26 = vector.broadcast %cst_12 : f32 to vector<8x1xf32>
    %27 = arith.maximumf %25, %26 : vector<8x1xf32>
    %cst_13 = arith.constant 9.99999974E-6 : f32
    %28 = vector.broadcast %cst_13 : f32 to vector<8x1xf32>
    %29 = arith.addf %27, %28 : vector<8x1xf32>
    %30 = math.rsqrt %29 : vector<8x1xf32>
    %31 = vector.broadcast %19 : vector<8x1xf32> to vector<8x128xf32>
    %32 = arith.subf %13, %31 : vector<8x128xf32>
    %c0_14 = arith.constant 0 : index
    %c0_15 = arith.constant 0 : index
    %33 = vector.load %arg4[%c0_14, %c0_15] : memref<1x128xf32, #tpu.memory_space<vmem>>, vector<1x128xf32>
    %34 = vector.broadcast %30 : vector<8x1xf32> to vector<8x128xf32>
    %35 = vector.broadcast %33 : vector<1x128xf32> to vector<8x128xf32>
    %36 = arith.mulf %34, %35 : vector<8x128xf32>
    %37 = arith.mulf %32, %36 : vector<8x128xf32>
    %38 = math.exp %37 : vector<8x128xf32>
    %c0_16 = arith.constant 0 : index
    %c0_17 = arith.constant 0 : index
    %39 = vector.load %arg5[%c0_16, %c0_17] : memref<8x128xf32, #tpu.memory_space<vmem>>, vector<8x128xf32>
    tpu.vector_store %arg5[%c0_16, %c0_17], %38 {strides = array<i32>} : memref<8x128xf32, #tpu.memory_space<vmem>>, vector<8x128xf32>,
    return
  }
  func.func @transform_0(%arg0: i32) -> (i32, i32) {
    %c0_i32 = arith.constant 0 : i32
    %c0_i32_0 = arith.constant 0 : i32
    return %arg0, %c0_i32 : i32, i32
  }
  func.func @transform_1(%arg0: i32) -> (i32, i32) {
    %c0_i32 = arith.constant 0 : i32
    %c0_i32_0 = arith.constant 0 : i32
    %c0_i32_1 = arith.constant 0 : i32
    return %c0_i32, %c0_i32_0 : i32, i32
  }
  func.func @transform_2(%arg0: i32) -> (i32, i32) {
    %c0_i32 = arith.constant 0 : i32
    %c0_i32_0 = arith.constant 0 : i32
    %c0_i32_1 = arith.constant 0 : i32
    return %c0_i32, %c0_i32_0 : i32, i32
  }
  func.func @transform_3(%arg0: i32) -> (i32, i32) {
    %c0_i32 = arith.constant 0 : i32
    %c0_i32_0 = arith.constant 0 : i32
    %c0_i32_1 = arith.constant 0 : i32
    return %c0_i32, %c0_i32_0 : i32, i32
  }
  func.func @transform_4(%arg0: i32) -> (i32, i32) {
    %c0_i32 = arith.constant 0 : i32
    %c0_i32_0 = arith.constant 0 : i32
    return %arg0, %c0_i32 : i32, i32
  }
}

</mosaic_0001>

<bundles_post_ra>
// kernel: tpu_custom_call.1
= control target key start
LH: loop header
LB: loop body
LE: loop exit
PB: predicated region body
PF: predicated region fallthrough
CT: control target
= control target key end

     0   :  { %9 = vsyncpa [#allocation3], 0  ;;  %s330_s0 = inlined_call_operand.hbm [shape: f32[8,32], index: 0, kind: input, shape index: {}]   ;;  %s331_s1 = inlined_call_operand.hbm [shape: f32[32,128], index: 1, kind: input, shape index: {}]   ;;  %s332_s2 = inlined_call_operand.vmem [shape: f32[1,128], index: 2, kind: input, shape index: {}]   ;;  %s333_s3 = inlined_call_operand.vmem [shape: f32[1,128], index: 3, kind: input, shape index: {}]   ;;  %s334_s4 = inlined_call_operand.hbm [shape: f32[8,128], index: 4, kind: output, shape index: {}]  }
   0x1   :  { %10 = vsyncpa [#allocation6], 0 }
   0x2   :  { %11 = vsyncpa [#allocation4], 0  ;;  %s283_s15 = smov [#allocation2]   ;;  %s284_s17 = smov [#allocation5]  }
   0x3   :  { %s18_s16 = sshll.u32 %s283_s15, 4  ;;  %s27_s18 = sshll.u32 %s284_s17, 4  ;;  %s19_s16 = int_to_ptr.vmem [resolvable:$true] %s18_s16  ;;  %s28_s18 = int_to_ptr.vmem [resolvable:$true] %s27_s18 }
   0x4   :  { %s225_s19 = scalar_lea.vmem %s19_s16, 128  ;;  %p230_p1 = scmp.lt.s32.totalorder %s19_s16, %s19_s16 }
   0x5   :  { %p226_p0 = scmp.ne.s32.totalorder %s19_s16, %s225_s19  ;;  %p231_p2 = scmp.lt.s32.totalorder %s225_s19, %s225_s19 }
   0x7   :  { %p232_p3 = por %p231_p2, %p230_p1 }
   0x9   :  { %p233_p4 = pnand %p232_p3, %p226_p0 }
   0xb   :  { %236 = shalt.err (!%p233_p4)
}
   0xc   :  { %21 = dma.hbm_to_vmem [thread:$0]  %s330_s0, 128, %s19_s16, [#allocation3]  }
   0xd   :  { %s245_s22 = scalar_lea.vmem %s28_s18, 512  ;;  %p250_p6 = scmp.lt.s32.totalorder %s28_s18, %s28_s18 }
   0xe   :  { %p246_p5 = scmp.ne.s32.totalorder %s28_s18, %s245_s22  ;;  %p251_p7 = scmp.lt.s32.totalorder %s245_s22, %s245_s22 }
  0x10   :  { %p252_p8 = por %p251_p7, %p250_p6 }
  0x12   :  { %p253_p9 = pnand %p252_p8, %p246_p5 }
  0x14   :  { %256 = shalt.err (!%p253_p9)
}
  0x15   :  { %s285_s23 = smov 128   ;;  %s286_s24 = smov 8  }
  0x16   :  { %33 = dma.hbm_to_vmem [thread:$0]  %s331_s1, 512, %s28_s18, [#allocation6], %s285_s23, %s285_s23, %s286_s24  }
  0x17   :  { %277 = dma.done.wait [#allocation3], 128  }
  0x18   :  { %278 = vsyncadd [#allocation3], 4294967168 }
  0x19   :  { %279 = dma.done.wait [#allocation6], 512  }
  0x1a   :  { %280 = vsyncadd [#allocation6], 4294966784  ;;  %v287_v0 = vmov 0.0   ;;  %vm288_vm0 = vmmov 0   ;;  %v48_v1 = vld [vmem:[#allocation5 + $0x18] sm:$0xff]  ;;  %v47_v2 = vld [vmem:[#allocation5 + $0x10] sm:$0xff] }
  0x1b   :  { %193 = vmatprep.subr.mxu0 %v287_v0  ;;  %201 = vmatprep.mubr.msk.f32.mxu0 %vm288_vm0, %v287_v0  ;;  %v44_v3 = vld [vmem:[#allocation2] sm:$0xff]  ;;  %v46_v4 = vld [vmem:[#allocation5 + $0x8] sm:$0xff]  ;;  %vm50_vm1 = vcmask 261120   ;;  %v45_v6 = vld [vmem:[#allocation5] sm:$0xff]  ;;  %s289_s28 = smov [#allocation7]  }
  0x1c   :  { %194 = vmatpush3.msra.mxu0 %v48_v1  ;;  %v49_v5 = vmul.f32 %v44_v3, %v44_v3  ;;  %v186_v10 = vld [vmem:[%s332_s2] ss:$0 sm:$0xff]  ;;  %s175_s29 = sshll.u32 %s289_s28, 4  ;;  %s176_s29 = int_to_ptr.vmem [resolvable:$true] %s175_s29 }
  0x1d   :  { %195 = vmatprep.subr.mxu0 %v287_v0  ;;  %v187_v29 = vld [vmem:[%s333_s3] ss:$0 sm:$0xff]  ;;  %s257_s30 = scalar_lea.vmem %s176_s29, 128  ;;  %p262_p11 = scmp.lt.s32.totalorder %s176_s29, %s176_s29 }
  0x1e   :  { %196 = vmatpush3.msra.mxu0 %v47_v2  ;;  %v51_v7 = vsel %vm50_vm1, %v49_v5, 0.0  ;;  %p258_p10 = scmp.ne.s32.totalorder %s176_s29, %s257_s30  ;;  %p263_p12 = scmp.lt.s32.totalorder %s257_s30, %s257_s30 }
  0x1f   :  { %197 = vmatprep.subr.mxu0 %v287_v0  ;;  %52 = vadd.xlane.f32.xlu0 %v51_v7 }
  0x20   :  { %198 = vmatpush3.msra.mxu0 %v46_v4  ;;  %p264_p13 = por %p263_p12, %p262_p11 }
  0x21   :  { %199 = vmatprep.subr.mxu0 %v287_v0 }
  0x22   :  { %200 = vmatpush3.msra.mxu0 %v45_v6  ;;  %p265_p0 = pnand %p264_p13, %p258_p10 }
  0x23   :  { %202 = vmatmul.mubr.msk.f32.vlgmr.msra.gmra.mxu0 %vm50_vm1, %v44_v3 }
  0xa8   :  { %v53_v8 = vpop.xlane.xlu0 %52 }
  0xe3   :  { %v123_v9 = vpop.f32.mrf.mxu0 }
  0xe4   :  { %v124_v11 = vadd.f32 %v123_v9, %v53_v8 }
  0xe5   :  { %v203_v12 = vpop.f32.mrf.mxu0 }
  0xe6   :  { %v134_v13 = vadd.f32 %v186_v10, %v124_v11 }
  0xe8   :  { %v135_v14 = vmax.f32 %v134_v13, 0.0 }
  0xea   :  { %145 = vadd.xlane.f32.xlu1 %v135_v14  ;;  %211 = vrsqrt.f32 %v135_v14  ;;  %vm138_vm2 = vcmp.eq.f32.partialorder %v135_v14, inf  ;;  %v141_v17 = vand.u32 2147483648, %v135_v14  ;;  %vm140_vm3 = vcmp.eq.f32.partialorder %v135_v14, 0.0 }
  0xf7   :  { %v212_v15 = vpop.eup %211 }
  0xf8   :  { %v137_v16 = vmul.f32 %v212_v15, %v135_v14 }
  0xfa   :  { %v139_v18 = vsel %vm138_vm2, %v135_v14, %v137_v16 }
  0xfb   :  { %v142_v19 = vsel %vm140_vm3, %v141_v17, %v139_v18 }
  0xfc   :  { %147 = vmin.xlane.f32.xlu1 %v142_v19  ;;  %143 = vadd.xlane.f32.xlu0 %v142_v19 }
 0x173   :  { %v146_v23 = vpop.xlane.xlu1 %145 }
 0x185   :  { %v144_v20 = vpop.xlane.xlu0 %143  ;;  %v148_v28 = vpop.xlane.xlu1 %147 }
 0x186   :  { %v149_v21 = vmul.f32 %v144_v20, %v144_v20  ;;  %v156_v31 = vsub.f32 %v142_v19, %v148_v28 }
 0x188   :  { %v150_v22 = vmul.f32 0.0078125, %v149_v21 }
 0x18a   :  { %v151_v24 = vsub.f32 %v146_v23, %v150_v22 }
 0x18c   :  { %v152_v25 = vmul.f32 0.007874016, %v151_v24 }
 0x18e   :  { %v153_v26 = vmax.f32 %v152_v25, 0.0 }
 0x190   :  { %v154_v27 = vadd.f32 1e-05, %v153_v26 }
 0x192   :  { %213 = vrsqrt.f32 %v154_v27 }
 0x19f   :  { %v214_v30 = vpop.eup %213 }
 0x1a0   :  { %v164_v32 = vmul.f32 %v214_v30, %v187_v29 }
 0x1a2   :  { %v165_v33 = vmul.f32 %v164_v32, %v156_v31 }
 0x1a4   :  { %v166_v34 = vmul.f32 1.442695, %v165_v33 }
 0x1a6   :  { %215 = vpow2.f32 %v166_v34 }
 0x1b3   :  { %v216_v35 = vpop.eup %215 }
 0x1b4   :  { %168 = vst [vmem:[#allocation7] sm:$0xff] %v216_v35 }
 0x1b5   :  { %268 = shalt.err (!%p265_p0)
}
 0x1b6   :  { %178 = dma.vmem_to_hbm [thread:$0]  %s176_s29, 128, %s334_s4, [#allocation4]  }
 0x1b7   :  { %281 = dma.done.wait [#allocation4], 128  }
 0x1b8   :  { %282 = vsyncadd [#allocation4], 4294967168 }
 0x1b9   :  { %182 = vsyncpa [#allocation3], 1 }
 0x1ba   :  { %183 = vsyncpa [#allocation6], 1 }
 0x1bb   :  { %184 = vsyncpa [#allocation4], 1 }

</bundles_post_ra>
